<compile_context>
chip_gen: v7x
topology: tpu7x:2x2x1
jax: 0.10.0
libtpu: 0.0.40
codegen_flags: <defaults>
</compile_context>

<pallas_src>
import jax
import jax.numpy as jnp
from jax import lax
from jax.experimental import pallas as pl
from jax.experimental.pallas import tpu as pltpu


_OFFS = tuple((dh, dw) for dh in (-1, 0, 1) for dw in (-1, 0, 1))  # kh,kw major


def _make_fused_kernel(H, W, block_images):
    HW = H * W
    L = block_images * HW  # lanes per grid step (batch packed on lane axis)

    def kernel(x_ref, m_ref, w1_ref, b1_ref, w2_ref, b2_ref, out_ref):
        # x_ref  : (Cin,  L) f32    activations, images contiguous on lanes
        # m_ref  : (9,    L) f32    0/1 'same'-padding validity mask per tap
        # w1_ref : (Cmid, 9*Cin)  bf16 (BN scale folded)   b1_ref: (Cmid, 1) f32
        # w2_ref : (Cout, 9*Cmid) bf16 (BN scale folded)   b2_ref: (Cout, 1) f32
        # out_ref: (Cout, L)
        masks = m_ref[...]

        def im2col(x):
            # x: (C, L) f32 -> (9*C, L) bf16, the 9 taps stacked on the K axis.
            # Spatial shift = static lane roll (XLU) + precomputed mask (VPU);
            # kept in f32 (v5e has no bf16 VPU), cast to bf16 once for the MXU.
            parts = []
            for t, (dh, dw) in enumerate(_OFFS):
                d = dh * W + dw
                if d == 0:
                    parts.append(x)                       # center tap: no mask
                else:
                    xt = pltpu.roll(x, shift=(-d) % L, axis=1)
                    parts.append(xt * masks[t:t + 1, :])  # zero out-of-image
            return jnp.concatenate(parts, axis=0).astype(jnp.bfloat16)

        def conv_bn_relu(x, w_ref, b_ref):
            xs = im2col(x)                                   # (9*C, L) bf16
            acc = jnp.dot(w_ref[...], xs,                    # one MXU matmul
                          preferred_element_type=jnp.float32)
            return jnp.maximum(acc + b_ref[...], 0.0)        # f32 epilogue

        x = x_ref[...].astype(jnp.float32)
        y1 = conv_bn_relu(x, w1_ref, b1_ref)
        y2 = conv_bn_relu(y1, w2_ref, b2_ref)
        out_ref[...] = y2.astype(out_ref.dtype)

    return kernel


def _fold_and_stack(p, eps=1e-5):
    """PyTorch (Cout,Cin,3,3) weight + bias + eval-BN -> (Cout,9*Cin) bf16 and
    per-channel shift.  Taps are kh,kw-major on the K axis to match im2col."""
    w = p["w"]
    cout, cin = w.shape[0], w.shape[1]
    scale = p["gamma"] / jnp.sqrt(p["rvar"] + eps)
    shift = (p["b"] - p["rmean"]) * scale + p["beta"]
    w_k = jnp.transpose(w, (0, 2, 3, 1)).reshape(cout, 9 * cin)   # [o, t*Cin+c]
    w_k = (w_k * scale[:, None]).astype(jnp.bfloat16)             # fold BN scale
    return w_k, shift.reshape(cout, 1).astype(jnp.float32)


def _make_tap_masks(H, W, L):
    """(9, L) f32 0/1 validity masks; lane index mod HW gives the pixel, so the
    masks also neutralize rolls that wrap across image boundaries in a tile."""
    HW = H * W
    p = jnp.arange(L, dtype=jnp.int32) % HW
    hh = p // W
    ww = p % W
    rows = []
    for dh, dw in _OFFS:
        ok = (hh + dh >= 0) & (hh + dh < H) & (ww + dw >= 0) & (ww + dw < W)
        rows.append(ok)
    return jnp.stack(rows, axis=0).astype(jnp.float32)


def _pick_block_images(N, HW, target_lanes=4096):
    """Images per grid step: amortize per-step overhead, keep lanes %128 == 0."""
    bi = max(1, min(N, target_lanes // max(HW, 1)))
    while N % bi != 0:
        bi -= 1
    if (bi * HW) % 128 != 0:
        bi = N  # full-array block is always layout-legal
    return bi


def conv_block_2d(x_nchw, p1, p2, *, block_images=None):
    """Fused ConvBlock2D forward (eval mode). Input/output NCHW (PyTorch)."""
    N, Cin, H, W = x_nchw.shape
    HW = H * W
    Cmid = p1["w"].shape[0]
    Cout = p2["w"].shape[0]

    if block_images is None:
        block_images = _pick_block_images(N, HW)
    assert N % block_images == 0
    L = block_images * HW
    grid_n = N // block_images

    # (N, Cin, H, W) -> (Cin, N*HW): batch+spatial on the lane axis (wrapper-side
    # transpose, one-time XLA op).
    x_lanes = jnp.transpose(x_nchw.reshape(N, Cin, HW), (1, 0, 2)).reshape(Cin, N * HW)

    masks = _make_tap_masks(H, W, L)          # (9, L), VMEM-resident across steps
    w1, b1 = _fold_and_stack(p1)              # (Cmid, 9*Cin) bf16, (Cmid,1) f32
    w2, b2 = _fold_and_stack(p2)              # (Cout, 9*Cmid) bf16, (Cout,1) f32

    out_lanes = pl.pallas_call(
        _make_fused_kernel(H, W, block_images),
        out_shape=jax.ShapeDtypeStruct((Cout, N * HW), x_nchw.dtype),
        grid_spec=pltpu.PrefetchScalarGridSpec(
            num_scalar_prefetch=0,
            grid=(grid_n,),
            in_specs=[
                pl.BlockSpec((Cin, L), lambda n: (0, n)),          # activations
                pl.BlockSpec((9, L), lambda n: (0, 0)),            # tap masks
                pl.BlockSpec((Cmid, 9 * Cin), lambda n: (0, 0)),   # w1 (resident)
                pl.BlockSpec((Cmid, 1), lambda n: (0, 0)),         # shift1
                pl.BlockSpec((Cout, 9 * Cmid), lambda n: (0, 0)),  # w2 (resident)
                pl.BlockSpec((Cout, 1), lambda n: (0, 0)),         # shift2
            ],
            out_specs=pl.BlockSpec((Cout, L), lambda n: (0, n)),
        ),
        compiler_params=pltpu.CompilerParams(
            dimension_semantics=("parallel",)),
    )(x_lanes, masks, w1, b1, w2, b2)

    return (out_lanes.reshape(Cout, N, HW)
            .transpose(1, 0, 2)
            .reshape(N, Cout, H, W))


def make_params(key, in_channels, out_channels):
    """Deterministic synthetic parameters for one BasicConv2d (PyTorch layout)."""
    k1, k2, k3, k4, k5, k6 = jax.random.split(key, 6)
    w = jax.random.normal(k1, (out_channels, in_channels, 3, 3),
                          jnp.float32) * 0.1
    b = jax.random.normal(k2, (out_channels,), jnp.float32) * 0.1
    gamma = 1.0 + 0.1 * jax.random.normal(k3, (out_channels,), jnp.float32)
    beta = 0.1 * jax.random.normal(k4, (out_channels,), jnp.float32)
    rmean = 0.1 * jax.random.normal(k5, (out_channels,), jnp.float32)
    rvar = jnp.abs(1.0 + 0.1 * jax.random.normal(k6, (out_channels,),
                                                 jnp.float32))
    return dict(w=w, b=b, gamma=gamma, beta=beta, rmean=rmean, rvar=rvar)


def _reference(x_nchw, p1, p2, eps=1e-5):
    """Pure-JAX f32 reference (lax conv, NCHW/OIHW) for correctness checking."""
    def block(x, p):
        y = lax.conv_general_dilated(
            x, p["w"], window_strides=(1, 1), padding=((1, 1), (1, 1)),
            dimension_numbers=("NCHW", "OIHW", "NCHW"),
            precision=lax.Precision.HIGHEST)
        scale = p["gamma"] / jnp.sqrt(p["rvar"] + eps)
        shift = (p["b"] - p["rmean"]) * scale + p["beta"]
        return jnp.maximum(y * scale[None, :, None, None]
                           + shift[None, :, None, None], 0.0)
    return block(block(x_nchw, p1), p2)


if __name__ == "__main__":
    key = jax.random.PRNGKey(0)
    kx, kp1, kp2 = jax.random.split(key, 3)

    N, Cin, Cout, H, W = 2, 4, 8, 16, 16
    x = jax.random.normal(kx, (N, Cin, H, W), jnp.float32)

    p1 = make_params(kp1, Cin, Cout)
    p2 = make_params(kp2, Cout, Cout)

    out = jax.block_until_ready(conv_block_2d(x, p1, p2))
    ref = jax.block_until_ready(_reference(x, p1, p2))

    assert out.shape == (N, Cout, H, W), out.shape
    max_err = float(jnp.max(jnp.abs(out - ref)))
    # bf16 MXU operands (per perf review) -> looser tolerance than pure-f32.
    assert jnp.allclose(out, ref, atol=5e-2, rtol=5e-2), max_err

    print("KERNEL_OK")
</pallas_src>

<mosaic_0001>
module attributes {stable_mosaic.version = 11 : i64} {
  func.func @kernel(%arg0: i32, %arg1: memref<4x512xf32, #tpu.memory_space<vmem>>, %arg2: memref<9x512xf32, #tpu.memory_space<vmem>>, %arg3: memref<8x36xbf16, #tpu.memory_space<vmem>>, %arg4: memref<8x1xf32, #tpu.memory_space<vmem>>, %arg5: memref<8x72xbf16, #tpu.memory_space<vmem>>, %arg6: memref<8x1xf32, #tpu.memory_space<vmem>>, %arg7: memref<8x512xf32, #tpu.memory_space<vmem>>) attributes {dimension_semantics = [#tpu.dimension_semantics<parallel>], iteration_bounds = array<i64: 1>, scalar_prefetch = 0 : i64, scratch_operands = 0 : i64, tpu.core_type = #tpu.core_type<tc>, window_params = [{transform_indices = @transform_0, window_bounds = array<i64: 4, 512>}, {pipeline_mode = #tpu.pipeline_mode<synchronous>, transform_indices = @transform_1, window_bounds = array<i64: 9, 512>}, {pipeline_mode = #tpu.pipeline_mode<synchronous>, transform_indices = @transform_2, window_bounds = array<i64: 8, 36>}, {pipeline_mode = #tpu.pipeline_mode<synchronous>, transform_indices = @transform_3, window_bounds = array<i64: 8, 1>}, {pipeline_mode = #tpu.pipeline_mode<synchronous>, transform_indices = @transform_4, window_bounds = array<i64: 8, 72>}, {pipeline_mode = #tpu.pipeline_mode<synchronous>, transform_indices = @transform_5, window_bounds = array<i64: 8, 1>}, {transform_indices = @transform_6, window_bounds = array<i64: 8, 512>}]} {
    %c0 = arith.constant 0 : index
    %c0_0 = arith.constant 0 : index
    %0 = vector.load %arg2[%c0, %c0_0] : memref<9x512xf32, #tpu.memory_space<vmem>>, vector<9x512xf32>
    %c0_1 = arith.constant 0 : index
    %c0_2 = arith.constant 0 : index
    %1 = vector.load %arg1[%c0_1, %c0_2] : memref<4x512xf32, #tpu.memory_space<vmem>>, vector<4x512xf32>
    %c17_i32 = arith.constant 17 : i32
    %2 = tpu.dynamic_rotate %1 by %c17_i32 dim 1 : vector<4x512xf32>, i32 -> vector<4x512xf32>
    %3 = vector.extract_strided_slice %0 {offsets = [0, 0], sizes = [1, 512], strides = [1, 1]} : vector<9x512xf32> to vector<1x512xf32>
    %4 = vector.broadcast %3 : vector<1x512xf32> to vector<4x512xf32>
    %5 = arith.mulf %2, %4 : vector<4x512xf32>
    %c16_i32 = arith.constant 16 : i32
    %6 = tpu.dynamic_rotate %1 by %c16_i32 dim 1 : vector<4x512xf32>, i32 -> vector<4x512xf32>
    %7 = vector.extract_strided_slice %0 {offsets = [1, 0], sizes = [1, 512], strides = [1, 1]} : vector<9x512xf32> to vector<1x512xf32>
    %8 = vector.broadcast %7 : vector<1x512xf32> to vector<4x512xf32>
    %9 = arith.mulf %6, %8 : vector<4x512xf32>
    %c15_i32 = arith.constant 15 : i32
    %10 = tpu.dynamic_rotate %1 by %c15_i32 dim 1 : vector<4x512xf32>, i32 -> vector<4x512xf32>
    %11 = vector.extract_strided_slice %0 {offsets = [2, 0], sizes = [1, 512], strides = [1, 1]} : vector<9x512xf32> to vector<1x512xf32>
    %12 = vector.broadcast %11 : vector<1x512xf32> to vector<4x512xf32>
    %13 = arith.mulf %10, %12 : vector<4x512xf32>
    %c1_i32 = arith.constant 1 : i32
    %14 = tpu.dynamic_rotate %1 by %c1_i32 dim 1 : vector<4x512xf32>, i32 -> vector<4x512xf32>
    %15 = vector.extract_strided_slice %0 {offsets = [3, 0], sizes = [1, 512], strides = [1, 1]} : vector<9x512xf32> to vector<1x512xf32>
    %16 = vector.broadcast %15 : vector<1x512xf32> to vector<4x512xf32>
    %17 = arith.mulf %14, %16 : vector<4x512xf32>
    %c511_i32 = arith.constant 511 : i32
    %18 = tpu.dynamic_rotate %1 by %c511_i32 dim 1 : vector<4x512xf32>, i32 -> vector<4x512xf32>
    %19 = vector.extract_strided_slice %0 {offsets = [5, 0], sizes = [1, 512], strides = [1, 1]} : vector<9x512xf32> to vector<1x512xf32>
    %20 = vector.broadcast %19 : vector<1x512xf32> to vector<4x512xf32>
    %21 = arith.mulf %18, %20 : vector<4x512xf32>
    %c497_i32 = arith.constant 497 : i32
    %22 = tpu.dynamic_rotate %1 by %c497_i32 dim 1 : vector<4x512xf32>, i32 -> vector<4x512xf32>
    %23 = vector.extract_strided_slice %0 {offsets = [6, 0], sizes = [1, 512], strides = [1, 1]} : vector<9x512xf32> to vector<1x512xf32>
    %24 = vector.broadcast %23 : vector<1x512xf32> to vector<4x512xf32>
    %25 = arith.mulf %22, %24 : vector<4x512xf32>
    %c496_i32 = arith.constant 496 : i32
    %26 = tpu.dynamic_rotate %1 by %c496_i32 dim 1 : vector<4x512xf32>, i32 -> vector<4x512xf32>
    %27 = vector.extract_strided_slice %0 {offsets = [7, 0], sizes = [1, 512], strides = [1, 1]} : vector<9x512xf32> to vector<1x512xf32>
    %28 = vector.broadcast %27 : vector<1x512xf32> to vector<4x512xf32>
    %29 = arith.mulf %26, %28 : vector<4x512xf32>
    %c495_i32 = arith.constant 495 : i32
    %30 = tpu.dynamic_rotate %1 by %c495_i32 dim 1 : vector<4x512xf32>, i32 -> vector<4x512xf32>
    %31 = vector.extract_strided_slice %0 {offsets = [8, 0], sizes = [1, 512], strides = [1, 1]} : vector<9x512xf32> to vector<1x512xf32>
    %32 = vector.broadcast %31 : vector<1x512xf32> to vector<4x512xf32>
    %33 = arith.mulf %30, %32 : vector<4x512xf32>
    %34 = tpu.concatenate %5, %9, %13, %17, %1, %21, %25, %29, %33 in 0 : vector<4x512xf32>, vector<4x512xf32>, vector<4x512xf32>, vector<4x512xf32>, vector<4x512xf32>, vector<4x512xf32>, vector<4x512xf32>, vector<4x512xf32>, vector<4x512xf32> -> vector<36x512xf32>
    %35 = arith.truncf %34 : vector<36x512xf32> to vector<36x512xbf16>
    %c0_3 = arith.constant 0 : index
    %c0_4 = arith.constant 0 : index
    %36 = vector.load %arg3[%c0_3, %c0_4] : memref<8x36xbf16, #tpu.memory_space<vmem>>, vector<8x36xbf16>
    %cst = arith.constant dense<0.000000e+00> : vector<8x512xf32>
    %37 = tpu.matmul %36, %35, %cst {dimension_numbers = #tpu.dot_dimension_numbers<[1], [0], [0], [1], [0, 0, 1, 1], [], []>} : vector<8x36xbf16>, vector<36x512xbf16>, vector<8x512xf32> -> vector<8x512xf32>
    %c0_5 = arith.constant 0 : index
    %c0_6 = arith.constant 0 : index
    %38 = vector.load %arg4[%c0_5, %c0_6] : memref<8x1xf32, #tpu.memory_space<vmem>>, vector<8x1xf32>
    %39 = vector.broadcast %38 : vector<8x1xf32> to vector<8x512xf32>
    %40 = arith.addf %37, %39 : vector<8x512xf32>
    %cst_7 = arith.constant 0.000000e+00 : f32
    %41 = vector.broadcast %cst_7 : f32 to vector<8x512xf32>
    %42 = arith.maximumf %40, %41 : vector<8x512xf32>
    %c17_i32_8 = arith.constant 17 : i32
    %43 = tpu.dynamic_rotate %42 by %c17_i32_8 dim 1 : vector<8x512xf32>, i32 -> vector<8x512xf32>
    %44 = vector.extract_strided_slice %0 {offsets = [0, 0], sizes = [1, 512], strides = [1, 1]} : vector<9x512xf32> to vector<1x512xf32>
    %45 = vector.broadcast %44 : vector<1x512xf32> to vector<8x512xf32>
    %46 = arith.mulf %43, %45 : vector<8x512xf32>
    %c16_i32_9 = arith.constant 16 : i32
    %47 = tpu.dynamic_rotate %42 by %c16_i32_9 dim 1 : vector<8x512xf32>, i32 -> vector<8x512xf32>
    %48 = vector.extract_strided_slice %0 {offsets = [1, 0], sizes = [1, 512], strides = [1, 1]} : vector<9x512xf32> to vector<1x512xf32>
    %49 = vector.broadcast %48 : vector<1x512xf32> to vector<8x512xf32>
    %50 = arith.mulf %47, %49 : vector<8x512xf32>
    %c15_i32_10 = arith.constant 15 : i32
    %51 = tpu.dynamic_rotate %42 by %c15_i32_10 dim 1 : vector<8x512xf32>, i32 -> vector<8x512xf32>
    %52 = vector.extract_strided_slice %0 {offsets = [2, 0], sizes = [1, 512], strides = [1, 1]} : vector<9x512xf32> to vector<1x512xf32>
    %53 = vector.broadcast %52 : vector<1x512xf32> to vector<8x512xf32>
    %54 = arith.mulf %51, %53 : vector<8x512xf32>
    %c1_i32_11 = arith.constant 1 : i32
    %55 = tpu.dynamic_rotate %42 by %c1_i32_11 dim 1 : vector<8x512xf32>, i32 -> vector<8x512xf32>
    %56 = vector.extract_strided_slice %0 {offsets = [3, 0], sizes = [1, 512], strides = [1, 1]} : vector<9x512xf32> to vector<1x512xf32>
    %57 = vector.broadcast %56 : vector<1x512xf32> to vector<8x512xf32>
    %58 = arith.mulf %55, %57 : vector<8x512xf32>
    %c511_i32_12 = arith.constant 511 : i32
    %59 = tpu.dynamic_rotate %42 by %c511_i32_12 dim 1 : vector<8x512xf32>, i32 -> vector<8x512xf32>
    %60 = vector.extract_strided_slice %0 {offsets = [5, 0], sizes = [1, 512], strides = [1, 1]} : vector<9x512xf32> to vector<1x512xf32>
    %61 = vector.broadcast %60 : vector<1x512xf32> to vector<8x512xf32>
    %62 = arith.mulf %59, %61 : vector<8x512xf32>
    %c497_i32_13 = arith.constant 497 : i32
    %63 = tpu.dynamic_rotate %42 by %c497_i32_13 dim 1 : vector<8x512xf32>, i32 -> vector<8x512xf32>
    %64 = vector.extract_strided_slice %0 {offsets = [6, 0], sizes = [1, 512], strides = [1, 1]} : vector<9x512xf32> to vector<1x512xf32>
    %65 = vector.broadcast %64 : vector<1x512xf32> to vector<8x512xf32>
    %66 = arith.mulf %63, %65 : vector<8x512xf32>
    %c496_i32_14 = arith.constant 496 : i32
    %67 = tpu.dynamic_rotate %42 by %c496_i32_14 dim 1 : vector<8x512xf32>, i32 -> vector<8x512xf32>
    %68 = vector.extract_strided_slice %0 {offsets = [7, 0], sizes = [1, 512], strides = [1, 1]} : vector<9x512xf32> to vector<1x512xf32>
    %69 = vector.broadcast %68 : vector<1x512xf32> to vector<8x512xf32>
    %70 = arith.mulf %67, %69 : vector<8x512xf32>
    %c495_i32_15 = arith.constant 495 : i32
    %71 = tpu.dynamic_rotate %42 by %c495_i32_15 dim 1 : vector<8x512xf32>, i32 -> vector<8x512xf32>
    %72 = vector.extract_strided_slice %0 {offsets = [8, 0], sizes = [1, 512], strides = [1, 1]} : vector<9x512xf32> to vector<1x512xf32>
    %73 = vector.broadcast %72 : vector<1x512xf32> to vector<8x512xf32>
    %74 = arith.mulf %71, %73 : vector<8x512xf32>
    %75 = tpu.concatenate %46, %50, %54, %58, %42, %62, %66, %70, %74 in 0 : vector<8x512xf32>, vector<8x512xf32>, vector<8x512xf32>, vector<8x512xf32>, vector<8x512xf32>, vector<8x512xf32>, vector<8x512xf32>, vector<8x512xf32>, vector<8x512xf32> -> vector<72x512xf32>
    %76 = arith.truncf %75 : vector<72x512xf32> to vector<72x512xbf16>
    %c0_16 = arith.constant 0 : index
    %c0_17 = arith.constant 0 : index
    %77 = vector.load %arg5[%c0_16, %c0_17] : memref<8x72xbf16, #tpu.memory_space<vmem>>, vector<8x72xbf16>
    %cst_18 = arith.constant dense<0.000000e+00> : vector<8x512xf32>
    %78 = tpu.matmul %77, %76, %cst_18 {dimension_numbers = #tpu.dot_dimension_numbers<[1], [0], [0], [1], [0, 0, 1, 1], [], []>} : vector<8x72xbf16>, vector<72x512xbf16>, vector<8x512xf32> -> vector<8x512xf32>
    %c0_19 = arith.constant 0 : index
    %c0_20 = arith.constant 0 : index
    %79 = vector.load %arg6[%c0_19, %c0_20] : memref<8x1xf32, #tpu.memory_space<vmem>>, vector<8x1xf32>
    %80 = vector.broadcast %79 : vector<8x1xf32> to vector<8x512xf32>
    %81 = arith.addf %78, %80 : vector<8x512xf32>
    %cst_21 = arith.constant 0.000000e+00 : f32
    %82 = vector.broadcast %cst_21 : f32 to vector<8x512xf32>
    %83 = arith.maximumf %81, %82 : vector<8x512xf32>
    %c0_22 = arith.constant 0 : index
    %c0_23 = arith.constant 0 : index
    %84 = vector.load %arg7[%c0_22, %c0_23] : memref<8x512xf32, #tpu.memory_space<vmem>>, vector<8x512xf32>
    tpu.vector_store %arg7[%c0_22, %c0_23], %83 {strides = array<i32>} : memref<8x512xf32, #tpu.memory_space<vmem>>, vector<8x512xf32>,
    return
  }
  func.func @transform_0(%arg0: i32) -> (i32, i32) {
    %c0_i32 = arith.constant 0 : i32
    %c0_i32_0 = arith.constant 0 : i32
    return %c0_i32, %arg0 : i32, i32
  }
  func.func @transform_1(%arg0: i32) -> (i32, i32) {
    %c0_i32 = arith.constant 0 : i32
    %c0_i32_0 = arith.constant 0 : i32
    %c0_i32_1 = arith.constant 0 : i32
    return %c0_i32, %c0_i32_0 : i32, i32
  }
  func.func @transform_2(%arg0: i32) -> (i32, i32) {
    %c0_i32 = arith.constant 0 : i32
    %c0_i32_0 = arith.constant 0 : i32
    %c0_i32_1 = arith.constant 0 : i32
    return %c0_i32, %c0_i32_0 : i32, i32
  }
  func.func @transform_3(%arg0: i32) -> (i32, i32) {
    %c0_i32 = arith.constant 0 : i32
    %c0_i32_0 = arith.constant 0 : i32
    %c0_i32_1 = arith.constant 0 : i32
    return %c0_i32, %c0_i32_0 : i32, i32
  }
  func.func @transform_4(%arg0: i32) -> (i32, i32) {
    %c0_i32 = arith.constant 0 : i32
    %c0_i32_0 = arith.constant 0 : i32
    %c0_i32_1 = arith.constant 0 : i32
    return %c0_i32, %c0_i32_0 : i32, i32
  }
  func.func @transform_5(%arg0: i32) -> (i32, i32) {
    %c0_i32 = arith.constant 0 : i32
    %c0_i32_0 = arith.constant 0 : i32
    %c0_i32_1 = arith.constant 0 : i32
    return %c0_i32, %c0_i32_0 : i32, i32
  }
  func.func @transform_6(%arg0: i32) -> (i32, i32) {
    %c0_i32 = arith.constant 0 : i32
    %c0_i32_0 = arith.constant 0 : i32
    return %c0_i32, %arg0 : i32, i32
  }
}

</mosaic_0001>

<bundles_post_ra>
// kernel: tpu_custom_call.1
= control target key start
LH: loop header
LB: loop body
LE: loop exit
PB: predicated region body
PF: predicated region fallthrough
CT: control target
= control target key end

     0   :  { %11 = vsyncpa [#allocation3], 0  ;;  %s1442_s0 = inlined_call_operand.vmem [shape: f32[4,512], index: 0, kind: input, shape index: {}]   ;;  %s1443_s1 = inlined_call_operand.hbm [shape: f32[9,512], index: 1, kind: input, shape index: {}]   ;;  %s1444_s2 = inlined_call_operand.vmem [shape: bf16[8,36], index: 2, kind: input, shape index: {}]   ;;  %s1445_s3 = inlined_call_operand.vmem [shape: f32[8,1], index: 3, kind: input, shape index: {}]   ;;  %s1446_s4 = inlined_call_operand.vmem [shape: bf16[8,72], index: 4, kind: input, shape index: {}]   ;;  %s1447_s5 = inlined_call_operand.vmem [shape: f32[8,1], index: 5, kind: input, shape index: {}]   ;;  %s1448_s6 = inlined_call_operand.hbm [shape: f32[8,512], index: 6, kind: output, shape index: {}]  }
   0x1   :  { %12 = vsyncpa [#allocation4], 0  ;;  %s860_s21 = smov [#allocation2]   ;;  %s812_s25 = scalar_lea.hbm %s1443_s1, 1024 }
   0x2   :  { %s20_s22 = sshll.u32 %s860_s21, 4  ;;  %p813_p0 = scmp.ne.s32.totalorder %s1443_s1, %s812_s25  ;;  %s21_s22 = int_to_ptr.vmem [resolvable:$true] %s20_s22 }
   0x3   :  { %p816_p1 = scmp.lt.u32.totalorder %s812_s25, %s1443_s1 }
   0x5   :  { %p818_p2 = pnand %p816_p1, %p813_p0 }
   0x7   :  { %821 = shalt.err (!%p818_p2)
}
   0x8   :  { %s822_s30 = scalar_lea.vmem %s21_s22, 1024  ;;  %p827_p4 = scmp.lt.s32.totalorder %s21_s22, %s21_s22 }
   0x9   :  { %p823_p3 = scmp.ne.s32.totalorder %s21_s22, %s822_s30  ;;  %p828_p5 = scmp.lt.s32.totalorder %s822_s30, %s822_s30 }
   0xb   :  { %p829_p6 = por %p828_p5, %p827_p4 }
   0xd   :  { %p830_p7 = pnand %p829_p6, %p823_p3 }
   0xf   :  { %833 = shalt.err (!%p830_p7)
}
  0x10   :  { %s861_s7 = smov 512   ;;  %s862_s8 = smov 32  }
  0x11   :  { %26 = dma.hbm_to_vmem [thread:$0]  %s1443_s1, 1024, %s21_s22, [#allocation3], %s861_s7, %s861_s7, %s862_s8  }
  0x12   :  { %856 = dma.done.wait [#allocation3], 1024  }
  0x13   :  { %857 = vsyncadd [#allocation3], 4294966272  ;;  %v923_v0 = vld [vmem:[%s1442_s0 + $0x8] sm:$0xff]  ;;  %v928_v1 = vld [vmem:[%s1442_s0] sm:$0xff]  ;;  %s863_s15 = smov 16   ;;  %s864_s1 = smov 1   ;;  %v63_v8 = vlaneseq }
  0x14   :  { %94 = vrot.lane.b32.xlu1 %v923_v0, %s863_s15  ;;  %90 = vrot.lane.b32.xlu0 %v928_v1, %s863_s15  ;;  %v936_v2 = vcombine.high %v923_v0, %v923_v0  ;;  %v944_v3 = vcombine.high %v928_v1, %v928_v1  ;;  %s865_s0 = smov 17   ;;  %s866_s16 = smov 15   ;;  %v870_v4 = vmov 0   ;;  %v399_v5 = vld [vmem:[%s1445_s3] sm:$0xff]  ;;  %v1016_v18 = vld [vmem:[#allocation2 + $0x18] sm:$0xff]  ;;  %v1018_v19 = vld [vmem:[#allocation2 + $0x8] sm:$0xff] }
  0x15   :  { %s867_s17 = smov 127   ;;  %s868_s18 = smov 112   ;;  %454 = vmatprep.mubr.bf16.mxu0 %v870_v4  ;;  %495 = vmatprep.mubr.bf16.mxu1 %v870_v4  ;;  %v1008_v11 = vshrl.u32 %v63_v8, 7  ;;  %v1010_v14 = vand.u32 127, %v63_v8  ;;  %v1014_v17 = vld [vmem:[#allocation2] sm:$0xff]  ;;  %v1020_v22 = vld [vmem:[#allocation2 + $0x10] sm:$0xff] }
  0x16   :  { %s869_s19 = smov 113   ;;  %809 = vset.pattern.permute.xlu0 %v870_v4  ;;  %s871_s20 = smov 111   ;;  %vm369_vm3 = vcmask 1043456   ;;  %vm409_vm9 = vcmask 1041408   ;;  %vm405_vm10 = vcmask 293888   ;;  %vm663_vm11 = vcmask 588800  }
  0x17   :  { %v105_v15 = vsub.s32 1, %v1008_v11  ;;  %v171_v16 = vsub.s32 3, %v1008_v11  ;;  %v72_v23 = vsub.s32 0, %v1008_v11  ;;  %vm98_vm0 = vcmp.lt.s32.totalorder %v1010_v14, 16 }
  0x18   :  { %96 = vrot.lane.b32.xlu1 %v936_v2, %s863_s15  ;;  %156 = vrot.lane.b32.xlu0 %v928_v1, %s864_s1  ;;  %vm164_vm1 = vcmp.lt.s32.totalorder %v1010_v14, 1  ;;  %v138_v32 = vsub.s32 2, %v1008_v11  ;;  %vm65_vm2 = vcmp.lt.s32.totalorder %v1010_v14, 17  ;;  %vm131_vm4 = vcmp.lt.s32.totalorder %v1010_v14, 15 }
  0x19   :  { %v1025_v24 = vrot.slane %v1014_v17, %v105_v15  ;;  %v1028_v25 = vrot.slane %v1016_v18, %v105_v15  ;;  %v1032_v26 = vrot.slane %v1018_v19, %v171_v16  ;;  %v1035_v27 = vrot.slane %v1018_v19, %v105_v15 }
  0x1a   :  { %v1038_v28 = vrot.slane %v1020_v22, %v105_v15  ;;  %v1041_v29 = vrot.slane %v1014_v17, %v171_v16  ;;  %v1045_v33 = vrot.slane %v1020_v22, %v171_v16  ;;  %v1048_v34 = vrot.slane %v1016_v18, %v171_v16 }
  0x1b   :  { %v1052_v35 = vrot.slane %v1018_v19, %v72_v23  ;;  %v1059_v38 = vrot.slane %v1014_v17, %v72_v23  ;;  %v1066_v41 = vrot.slane %v1020_v22, %v72_v23  ;;  %v1069_v42 = vrot.slane %v1016_v18, %v72_v23 }
  0x1c   :  { %158 = vrot.lane.b32.xlu1 %v944_v3, %s864_s1  ;;  %92 = vrot.lane.b32.xlu0 %v944_v3, %s863_s15  ;;  %v1077_v47 = vrot.slane %v1018_v19, %v138_v32  ;;  %v1088_v54 = vrot.slane %v1014_v17, %v138_v32  ;;  %v1091_v55 = vrot.slane %v1020_v22, %v138_v32  ;;  %vm197_vm5 = vcmp.lt.s32.totalorder %v1010_v14, 127 }
  0x1d   :  { %v1098_v59 = vrot.slane %v1016_v18, %v138_v32  ;;  %vm263_vm6 = vcmp.lt.s32.totalorder %v1010_v14, 112  ;;  %vm230_vm7 = vcmp.lt.s32.totalorder %v1010_v14, 113  ;;  %vm296_vm8 = vcmp.lt.s32.totalorder %v1010_v14, 111 }
  0x20   :  { %162 = vrot.lane.b32.xlu1 %v936_v2, %s864_s1  ;;  %160 = vrot.lane.b32.xlu0 %v923_v0, %s864_s1 }
  0x24   :  { %57 = vrot.lane.b32.xlu1 %v944_v3, %s865_s0  ;;  %55 = vrot.lane.b32.xlu0 %v928_v1, %s865_s0 }
  0x28   :  { %61 = vrot.lane.b32.xlu1 %v936_v2, %s865_s0  ;;  %59 = vrot.lane.b32.xlu0 %v923_v0, %s865_s0 }
  0x2c   :  { %125 = vrot.lane.b32.xlu1 %v944_v3, %s866_s16  ;;  %123 = vrot.lane.b32.xlu0 %v928_v1, %s866_s16 }
  0x30   :  { %129 = vrot.lane.b32.xlu1 %v936_v2, %s866_s16  ;;  %127 = vrot.lane.b32.xlu0 %v923_v0, %s866_s16 }
  0x34   :  { %191 = vrot.lane.b32.xlu1 %v944_v3, %s867_s17  ;;  %189 = vrot.lane.b32.xlu0 %v928_v1, %s867_s17 }
  0x38   :  { %195 = vrot.lane.b32.xlu1 %v936_v2, %s867_s17  ;;  %193 = vrot.lane.b32.xlu0 %v923_v0, %s867_s17 }
  0x3c   :  { %257 = vrot.lane.b32.xlu1 %v944_v3, %s868_s18  ;;  %255 = vrot.lane.b32.xlu0 %v928_v1, %s868_s18 }
  0x40   :  { %261 = vrot.lane.b32.xlu1 %v936_v2, %s868_s18  ;;  %259 = vrot.lane.b32.xlu0 %v923_v0, %s868_s18 }
  0x44   :  { %224 = vrot.lane.b32.xlu1 %v944_v3, %s869_s19  ;;  %222 = vrot.lane.b32.xlu0 %v928_v1, %s869_s19 }
  0x48   :  { %228 = vrot.lane.b32.xlu1 %v936_v2, %s869_s19  ;;  %226 = vrot.lane.b32.xlu0 %v923_v0, %s869_s19 }
  0x4c   :  { %290 = vrot.lane.b32.xlu1 %v944_v3, %s871_s20  ;;  %288 = vrot.lane.b32.xlu0 %v928_v1, %s871_s20 }
  0x50   :  { %294 = vrot.lane.b32.xlu1 %v936_v2, %s871_s20  ;;  %292 = vrot.lane.b32.xlu0 %v923_v0, %s871_s20 }
  0x54   :  { %402 = vperm.xlu0 %809, %v399_v5  }
  0x86   :  { %v95_v6 = vpop.permute.xlu1 %94  ;;  %v91_v7 = vpop.permute.xlu0 %90 }
  0x8a   :  { %v97_v9 = vpop.permute.xlu1 %96  ;;  %v157_v10 = vpop.permute.xlu0 %156 }
  0x8b   :  { %v99_v36 = vsel %vm98_vm0, %v95_v6, %v97_v9  ;;  %v102_v37 = vsel %vm98_vm0, %v97_v9, %v91_v7 }
  0x8c   :  { %v119_v48 = vmul.f32 %v1025_v24, %v102_v37  ;;  %v122_v49 = vmul.f32 %v1028_v25, %v99_v36 }
  0x8e   :  { %v159_v12 = vpop.permute.xlu1 %158  ;;  %v93_v13 = vpop.permute.xlu0 %92  ;;  %v328_v8 = vrot.slane %v122_v49, 4 }
  0x8f   :  { %v167_v39 = vsel %vm164_vm1, %v157_v10, %v159_v12  ;;  %v101_v40 = vsel %vm98_vm0, %v91_v7, %v93_v13  ;;  %v100_v43 = vsel %vm98_vm0, %v93_v13, %v95_v6  ;;  %v325_v7 = vrot.slane %v119_v48, 4 }
  0x90   :  { %v186_v52 = vmul.f32 %v1032_v26, %v167_v39  ;;  %v120_v53 = vmul.f32 %v1035_v27, %v101_v40  ;;  %v121_v56 = vmul.f32 %v1038_v28, %v100_v43 }
  0x92   :  { %v163_v20 = vpop.permute.xlu1 %162  ;;  %v161_v21 = vpop.permute.xlu0 %160  ;;  %v326_v13 = vrot.slane %v120_v53, 4 }
  0x93   :  { %v168_v44 = vsel %vm164_vm1, %v163_v20, %v157_v10  ;;  %v166_v50 = vsel %vm164_vm1, %v159_v12, %v161_v21  ;;  %v165_v58 = vsel %vm164_vm1, %v161_v21, %v163_v20  ;;  %v338_v12 = vrot.slane %v186_v52, 4 }
  0x94   :  { %v185_v57 = vmul.f32 %v1041_v29, %v168_v44  ;;  %v187_v60 = vmul.f32 %v1045_v33, %v166_v50  ;;  %v188_v15 = vmul.f32 %v1048_v34, %v165_v58  ;;  %v327_v20 = vrot.slane %v121_v56, 4 }
  0x96   :  { %v58_v30 = vpop.permute.xlu1 %57  ;;  %v56_v31 = vpop.permute.xlu0 %55  ;;  %v337_v21 = vrot.slane %v185_v57, 4  ;;  %v339_v32 = vrot.slane %v187_v60, 4  ;;  %v340_v48 = vrot.slane %v188_v15, 4 }
  0x97   :  { %v68_v51 = vsel %vm65_vm2, %v56_v31, %v58_v30 }
  0x98   :  { %v87_v61 = vmul.f32 %v1052_v35, %v68_v51 }
  0x9a   :  { %v62_v45 = vpop.permute.xlu1 %61  ;;  %v60_v46 = vpop.permute.xlu0 %59  ;;  %v371_v39 = vsel %vm369_vm3, %v87_v61, %v326_v13 }
  0x9b   :  { %v69_v62 = vsel %vm65_vm2, %v62_v45, %v56_v31  ;;  %v66_v63 = vsel %vm65_vm2, %v60_v46, %v62_v45  ;;  %v67_v9 = vsel %vm65_vm2, %v58_v30, %v60_v46 }
  0x9c   :  { %v86_v23 = vmul.f32 %v1059_v38, %v69_v62  ;;  %v89_v31 = vmul.f32 %v1069_v42, %v66_v63  ;;  %v88_v36 = vmul.f32 %v1066_v41, %v67_v9 }
  0x9e   :  { %v126_v5 = vpop.permute.xlu1 %125  ;;  %v124_v6 = vpop.permute.xlu0 %123  ;;  %v370_v52 = vsel %vm369_vm3, %v86_v23, %v325_v7  ;;  %v373_v53 = vsel %vm369_vm3, %v89_v31, %v328_v8  ;;  %v372_v61 = vsel %vm369_vm3, %v88_v36, %v327_v20  ;;  %v204_v7 = vsub.s32 5, %v1008_v11 }
  0x9f   :  { %v134_v10 = vsel %vm131_vm4, %v124_v6, %v126_v5  ;;  %v270_v8 = vsub.s32 7, %v1008_v11 }
  0xa0   :  { %v153_v16 = vmul.f32 %v1077_v47, %v134_v10  ;;  %v1136_v15 = vrot.slane %v1014_v17, %v204_v7  ;;  %v1141_v20 = vrot.slane %v1016_v18, %v204_v7  ;;  %v1147_v23 = vrot.slane %v1020_v22, %v204_v7 }
  0xa1   :  { %v1150_v31 = vrot.slane %v1014_v17, %v270_v8 }
  0xa2   :  { %v130_v37 = vpop.permute.xlu1 %129  ;;  %v128_v30 = vpop.permute.xlu0 %127  ;;  %v375_v40 = vsel %vm369_vm3, %v153_v16, %v338_v12  ;;  %v237_v16 = vsub.s32 6, %v1008_v11 }
  0xa3   :  { %v135_v43 = vsel %vm131_vm4, %v130_v37, %v124_v6  ;;  %v132_v44 = vsel %vm131_vm4, %v128_v30, %v130_v37  ;;  %v133_v45 = vsel %vm131_vm4, %v126_v5, %v128_v30  ;;  %v387_v46 = vpack.c.bf16 %v375_v40, %v371_v39 }
  0xa4   :  { %v152_v49 = vmul.f32 %v1088_v54, %v135_v43  ;;  %v154_v50 = vmul.f32 %v1091_v55, %v133_v45  ;;  %v155_v51 = vmul.f32 %v1098_v59, %v132_v44  ;;  %v1159_v30 = vrot.slane %v1016_v18, %v270_v8 }
  0xa5   :  { %422 = vmatprep.subr.bf16.mxu0 %v387_v46  ;;  %v1168_v45 = vrot.slane %v1018_v19, %v270_v8 }
  0xa6   :  { %v192_v56 = vpop.permute.xlu1 %191  ;;  %v190_v57 = vpop.permute.xlu0 %189  ;;  %v374_v58 = vsel %vm369_vm3, %v152_v49, %v337_v21  ;;  %v377_v60 = vsel %vm369_vm3, %v155_v51, %v340_v48  ;;  %v376_v62 = vsel %vm369_vm3, %v154_v50, %v339_v32  ;;  %v1144_v21 = vrot.slane %v1018_v19, %v204_v7 }
  0xa7   :  { %v386_v63 = vpack.c.bf16 %v374_v58, %v370_v52  ;;  %v389_v5 = vpack.c.bf16 %v377_v60, %v373_v53  ;;  %v388_v6 = vpack.c.bf16 %v376_v62, %v372_v61  ;;  %v200_v32 = vsel %vm197_vm5, %v190_v57, %v192_v56 }
  0xa8   :  { %v1173_v48 = vrot.slane %v1020_v22, %v270_v8  ;;  %v1177_v49 = vrot.slane %v1014_v17, %v237_v16  ;;  %v218_v50 = vmul.f32 %v1136_v15, %v200_v32 }
  0xa9   :  { %423 = vmatpush1.bf16.msra.mxu0 %v386_v63  ;;  %463 = vmatprep.subr.bf16.mxu1 %v389_v5  ;;  %v1192_v5 = vrot.slane %v1016_v18, %v237_v16 }
  0xaa   :  { %v196_v9 = vpop.permute.xlu1 %195  ;;  %v194_v10 = vpop.permute.xlu0 %193  ;;  %464 = vmatpush1.bf16.msra.mxu1 %v388_v6  ;;  %v1195_v6 = vrot.slane %v1018_v19, %v237_v16 }
  0xab   :  { %v201_v36 = vsel %vm197_vm5, %v196_v9, %v190_v57  ;;  %v199_v11 = vsel %vm197_vm5, %v192_v56, %v194_v10  ;;  %v198_v40 = vsel %vm197_vm5, %v194_v10, %v196_v9  ;;  %v1198_v9 = vrot.slane %v1020_v22, %v237_v16 }
  0xac   :  { %v221_v51 = vmul.f32 %v1141_v20, %v201_v36  ;;  %v219_v52 = vmul.f32 %v1144_v21, %v199_v11  ;;  %v220_v56 = vmul.f32 %v1147_v23, %v198_v40  ;;  %v349_v10 = vrot.slane %v218_v50, 4 }
  0xae   :  { %v258_v12 = vpop.permute.xlu1 %257  ;;  %v256_v13 = vpop.permute.xlu0 %255  ;;  %v352_v7 = vrot.slane %v221_v51, 4  ;;  %v350_v8 = vrot.slane %v219_v52, 4  ;;  %v378_v52 = vsel %vm369_vm3, %v928_v1, %v349_v10 }
  0xaf   :  { %v266_v43 = vsel %vm263_vm6, %v256_v13, %v258_v12 }
  0xb0   :  { %v284_v57 = vmul.f32 %v1150_v31, %v266_v43  ;;  %v379_v50 = vsel %vm369_vm3, %v944_v3, %v350_v8  ;;  %v381_v51 = vsel %vm369_vm3, %v936_v2, %v352_v7  ;;  %v1228_v7 = vld [vmem:[#allocation2 + $0x38] ss:$0 sm:$0xff]  ;;  %v1230_v8 = vld [vmem:[#allocation2 + $0x28] ss:$0 sm:$0xff] }
  0xb2   :  { %v262_v37 = vpop.permute.xlu1 %261  ;;  %v260_v39 = vpop.permute.xlu0 %259  ;;  %v361_v32 = vrot.slane %v284_v57, 4 }
  0xb3   :  { %v267_v44 = vsel %vm263_vm6, %v262_v37, %v256_v13  ;;  %v265_v46 = vsel %vm263_vm6, %v258_v12, %v260_v39  ;;  %v264_v53 = vsel %vm263_vm6, %v260_v39, %v262_v37  ;;  %v351_v13 = vrot.slane %v220_v56, 4 }
  0xb4   :  { %v287_v58 = vmul.f32 %v1159_v30, %v267_v44  ;;  %v285_v17 = vmul.f32 %v1168_v45, %v265_v46  ;;  %v286_v63 = vmul.f32 %v1173_v48, %v264_v53  ;;  %v1211_v46 = vld [vmem:[#allocation2 + $0x20] ss:$0 sm:$0xff] }
  0xb6   :  { %v225_v60 = vpop.permute.xlu1 %224  ;;  %v223_v61 = vpop.permute.xlu0 %222  ;;  %v364_v36 = vrot.slane %v287_v58, 4  ;;  %v362_v18 = vrot.slane %v285_v17, 4  ;;  %v363_v39 = vrot.slane %v286_v63, 4 }
  0xb7   :  { %v233_v62 = vsel %vm230_vm7, %v223_v61, %v225_v60 }
  0xb8   :  { %v251_v12 = vmul.f32 %v1177_v49, %v233_v62 }
  0xba   :  { %v229_v11 = vpop.permute.xlu1 %228  ;;  %v227_v37 = vpop.permute.xlu0 %226  ;;  %v382_v53 = vsel %vm369_vm3, %v251_v12, %v361_v32  ;;  %v1232_v12 = vld [vmem:[#allocation2 + $0x30] ss:$0 sm:$0xff] }
  0xbb   :  { %v234_v19 = vsel %vm230_vm7, %v229_v11, %v223_v61  ;;  %v231_v22 = vsel %vm230_vm7, %v227_v37, %v229_v11  ;;  %v232_v16 = vsel %vm230_vm7, %v225_v60, %v227_v37  ;;  %v380_v61 = vsel %vm369_vm3, %v923_v0, %v351_v13 }
  0xbc   :  { %v254_v40 = vmul.f32 %v1192_v5, %v234_v19  ;;  %v252_v43 = vmul.f32 %v1195_v6, %v232_v16  ;;  %v253_v44 = vmul.f32 %v1198_v9, %v231_v22  ;;  %v390_v10 = vpack.c.bf16 %v382_v53, %v378_v52 }
  0xbe   :  { %v291_v56 = vpop.permute.xlu1 %290  ;;  %v289_v57 = vpop.permute.xlu0 %288  ;;  %v383_v58 = vsel %vm369_vm3, %v252_v43, %v362_v18  ;;  %v385_v60 = vsel %vm369_vm3, %v254_v40, %v364_v36  ;;  %v384_v17 = vsel %vm369_vm3, %v253_v44, %v363_v39 }
  0xbf   :  { %v299_v3 = vsel %vm296_vm8, %v289_v57, %v291_v56  ;;  %v391_v2 = vpack.c.bf16 %v383_v58, %v379_v50  ;;  %v393_v62 = vpack.c.bf16 %v385_v60, %v381_v51  ;;  %v392_v63 = vpack.c.bf16 %v384_v17, %v380_v61  ;;  %v398_v50 = vld [vmem:[%s1444_s2] sm:$0xf] }
  0xc0   :  { %v317_v1 = vmul.f32 %v1211_v46, %v299_v3 }
  0xc1   :  { %424 = vmatprep.subr.bf16.mxu0 %v391_v2  ;;  %465 = vmatprep.subr.bf16.mxu1 %v393_v62 }
  0xc2   :  { %v295_v0 = vpop.permute.xlu1 %294  ;;  %v293_v13 = vpop.permute.xlu0 %292  ;;  %425 = vmatpush1.bf16.msra.mxu0 %v390_v10  ;;  %466 = vmatpush1.bf16.msra.mxu1 %v392_v63  ;;  %v394_v37 = vpack.c.bf16 %v317_v1, %v317_v1 }
  0xc3   :  { %v300_v32 = vsel %vm296_vm8, %v295_v0, %v289_v57  ;;  %v297_v36 = vsel %vm296_vm8, %v293_v13, %v295_v0  ;;  %v298_v11 = vsel %vm296_vm8, %v291_v56, %v293_v13  ;;  %v657_v13 = vld [vmem:[%s1447_s5] sm:$0xff] }
  0xc4   :  { %v320_v18 = vmul.f32 %v1228_v7, %v300_v32  ;;  %v318_v19 = vmul.f32 %v1230_v8, %v298_v11  ;;  %v319_v22 = vmul.f32 %v1232_v12, %v297_v36  ;;  %v411_v43 = vsel %vm409_vm9, %v394_v37, 0 }
  0xc6   :  { %v397_v16 = vpack.c.bf16 %v320_v18, %v320_v18  ;;  %v395_v39 = vpack.c.bf16 %v318_v19, %v318_v19  ;;  %v396_v40 = vpack.c.bf16 %v319_v22, %v319_v22 }
  0xc8   :  { %788 = vmatprep.subr.msk.bf16.mxu0 %vm409_vm9, %v395_v39  ;;  %790 = vmatprep.subr.msk.bf16.mxu1 %vm409_vm9, %v397_v16  ;;  %v417_v44 = vsel %vm409_vm9, %v396_v40, 0 }
  0xc9   :  { %427 = vmatpush1.bf16.msra.mxu0 %v411_v43  ;;  %468 = vmatpush1.bf16.msra.mxu1 %v417_v44 }
  0xcc   :  { %789 = vmatmul.mubr.msk.bf16.vlgmr.msra.gmra.mrb[0].mxu0 %vm405_vm10, %v398_v50  ;;  %791 = vmatmul.mubr.msk.bf16.vlgmr.msra.gmra.mrb[0].mxu1 %vm405_vm10, %v398_v50 }
  0xcd   :  { %711 = vmatprep.mubr.bf16.mxu0 %v870_v4  ;;  %752 = vmatprep.mubr.bf16.mxu1 %v870_v4 }
  0xd3   :  { %v403_v51 = vpop.permute.xlu0 %402 }
 0x19f   :  { %v456_v52 = vpop.f32.mrb[0].mxu0  ;;  %v497_v53 = vpop.f32.mrb[0].mxu1 }
 0x1a0   :  { %v457_v56 = vadd.f32 %v456_v52, %v403_v51  ;;  %v498_v57 = vadd.f32 %v497_v53, %v403_v51  ;;  %v458_v58 = vpop.f32.mrb[1].mxu0  ;;  %v499_v60 = vpop.f32.mrb[1].mxu1 }
 0x1a1   :  { %v460_v61 = vpop.f32.mrb[2].mxu0  ;;  %v501_v17 = vpop.f32.mrb[2].mxu1  ;;  %v459_v62 = vadd.f32 %v458_v58, %v403_v51  ;;  %v500_v10 = vadd.f32 %v499_v60, %v403_v51 }
 0x1a2   :  { %v1248_v3 = vmax.f32 %v457_v56, 0.0  ;;  %v1250_v2 = vmax.f32 %v498_v57, 0.0  ;;  %v461_v63 = vpop.f32.mrb[3].mxu0  ;;  %v502_v1 = vpop.f32.mrb[3].mxu1 }
 0x1a3   :  { %v1256_v4 = vmax.f32 %v459_v62, 0.0  ;;  %v1262_v0 = vmax.f32 %v500_v10, 0.0 }
 0x1a4   :  { %512 = vrot.lane.b32.xlu0 %v1250_v2, %s865_s0  ;;  %508 = vrot.lane.b32.xlu1 %v1248_v3, %s865_s0 }
 0x1a8   :  { %524 = vrot.lane.b32.xlu0 %v1248_v3, %s863_s15  ;;  %510 = vrot.lane.b32.xlu1 %v1256_v4, %s865_s0 }
 0x1ac   :  { %528 = vrot.lane.b32.xlu0 %v1250_v2, %s863_s15  ;;  %514 = vrot.lane.b32.xlu1 %v1262_v0, %s865_s0 }
 0x1b0   :  { %540 = vrot.lane.b32.xlu0 %v1248_v3, %s866_s16  ;;  %526 = vrot.lane.b32.xlu1 %v1256_v4, %s863_s15 }
 0x1b4   :  { %544 = vrot.lane.b32.xlu0 %v1250_v2, %s866_s16  ;;  %530 = vrot.lane.b32.xlu1 %v1262_v0, %s863_s15 }
 0x1b8   :  { %556 = vrot.lane.b32.xlu0 %v1248_v3, %s864_s1  ;;  %542 = vrot.lane.b32.xlu1 %v1256_v4, %s866_s16 }
 0x1bc   :  { %560 = vrot.lane.b32.xlu0 %v1250_v2, %s864_s1  ;;  %546 = vrot.lane.b32.xlu1 %v1262_v0, %s866_s16 }
 0x1c0   :  { %572 = vrot.lane.b32.xlu0 %v1248_v3, %s867_s17  ;;  %558 = vrot.lane.b32.xlu1 %v1256_v4, %s864_s1 }
 0x1c4   :  { %576 = vrot.lane.b32.xlu0 %v1250_v2, %s867_s17  ;;  %562 = vrot.lane.b32.xlu1 %v1262_v0, %s864_s1 }
 0x1c8   :  { %588 = vrot.lane.b32.xlu0 %v1248_v3, %s869_s19  ;;  %574 = vrot.lane.b32.xlu1 %v1256_v4, %s867_s17 }
 0x1cc   :  { %592 = vrot.lane.b32.xlu0 %v1250_v2, %s869_s19  ;;  %578 = vrot.lane.b32.xlu1 %v1262_v0, %s867_s17 }
 0x1d0   :  { %604 = vrot.lane.b32.xlu0 %v1248_v3, %s868_s18  ;;  %590 = vrot.lane.b32.xlu1 %v1256_v4, %s869_s19 }
 0x1d4   :  { %608 = vrot.lane.b32.xlu0 %v1250_v2, %s868_s18  ;;  %594 = vrot.lane.b32.xlu1 %v1262_v0, %s869_s19 }
 0x1d8   :  { %620 = vrot.lane.b32.xlu0 %v1248_v3, %s871_s20  ;;  %606 = vrot.lane.b32.xlu1 %v1256_v4, %s868_s18 }
 0x1dc   :  { %624 = vrot.lane.b32.xlu0 %v1250_v2, %s871_s20  ;;  %610 = vrot.lane.b32.xlu1 %v1262_v0, %s868_s18 }
 0x1e0   :  { %660 = vperm.xlu0 %809, %v657_v13   ;;  %622 = vrot.lane.b32.xlu1 %v1256_v4, %s871_s20 }
 0x1e4   :  { %626 = vrot.lane.b32.xlu1 %v1262_v0, %s871_s20 }
 0x216   :  { %v513_v32 = vpop.permute.xlu0 %512  ;;  %v509_v36 = vpop.permute.xlu1 %508 }
 0x21a   :  { %v525_v11 = vpop.permute.xlu0 %524  ;;  %v511_v37 = vpop.permute.xlu1 %510 }
 0x21b   :  { %v518_v22 = vsel %vm65_vm2, %v509_v36, %v511_v37  ;;  %v517_v53 = vsel %vm65_vm2, %v511_v37, %v513_v32 }
 0x21c   :  { %v521_v43 = vmul.f32 %v518_v22, %v1052_v35  ;;  %v522_v1 = vmul.f32 %v517_v53, %v1066_v41 }
 0x21e   :  { %v529_v18 = vpop.permute.xlu0 %528  ;;  %v515_v19 = vpop.permute.xlu1 %514 }
 0x21f   :  { %v516_v51 = vsel %vm65_vm2, %v513_v32, %v515_v19  ;;  %v519_v52 = vsel %vm65_vm2, %v515_v19, %v509_v36 }
 0x220   :  { %v520_v61 = vmul.f32 %v519_v52, %v1059_v38  ;;  %v523_v17 = vmul.f32 %v516_v51, %v1069_v42 }
 0x222   :  { %v541_v16 = vpop.permute.xlu0 %540  ;;  %v527_v39 = vpop.permute.xlu1 %526 }
 0x223   :  { %v534_v40 = vsel %vm98_vm0, %v525_v11, %v527_v39  ;;  %v533_v44 = vsel %vm98_vm0, %v527_v39, %v529_v18 }
 0x224   :  { %v537_v50 = vmul.f32 %v534_v40, %v1035_v27  ;;  %v538_v60 = vmul.f32 %v533_v44, %v1038_v28 }
 0x226   :  { %v545_v56 = vpop.permute.xlu0 %544  ;;  %v531_v57 = vpop.permute.xlu1 %530  ;;  %v637_v58 = vpack.c.bf16 %v537_v50, %v521_v43  ;;  %v638_v36 = vpack.c.bf16 %v538_v60, %v522_v1 }
 0x227   :  { %v532_v35 = vsel %vm98_vm0, %v529_v18, %v531_v57  ;;  %v535_v27 = vsel %vm98_vm0, %v531_v57, %v525_v11 }
 0x228   :  { %v536_v62 = vmul.f32 %v535_v27, %v1025_v24  ;;  %v539_v63 = vmul.f32 %v532_v35, %v1028_v25  ;;  %679 = vmatprep.subr.bf16.mxu0 %v637_v58 }
 0x22a   :  { %v636_v10 = vpack.c.bf16 %v536_v62, %v520_v61  ;;  %v557_v13 = vpop.permute.xlu0 %556  ;;  %v543_v28 = vpop.permute.xlu1 %542  ;;  %v639_v32 = vpack.c.bf16 %v539_v63, %v523_v17 }
 0x22b   :  { %v550_v38 = vsel %vm131_vm4, %v541_v16, %v543_v28  ;;  %v549_v40 = vsel %vm131_vm4, %v543_v28, %v545_v56 }
 0x22c   :  { %680 = vmatpush1.bf16.msra.mxu0 %v636_v10  ;;  %720 = vmatprep.subr.bf16.mxu1 %v639_v32  ;;  %v553_v41 = vmul.f32 %v550_v38, %v1077_v47 }
 0x22d   :  { %721 = vmatpush1.bf16.msra.mxu1 %v638_v36 }
 0x22e   :  { %v561_v11 = vpop.permute.xlu0 %560  ;;  %v547_v37 = vpop.permute.xlu1 %546 }
 0x22f   :  { %v548_v22 = vsel %vm131_vm4, %v545_v56, %v547_v37  ;;  %v551_v39 = vsel %vm131_vm4, %v547_v37, %v541_v16  ;;  %v554_v56 = vmul.f32 %v549_v40, %v1091_v55 }
 0x230   :  { %v552_v52 = vmul.f32 %v551_v39, %v1088_v54  ;;  %v555_v53 = vmul.f32 %v548_v22, %v1098_v59 }
 0x232   :  { %v573_v42 = vpop.permute.xlu0 %572  ;;  %v559_v24 = vpop.permute.xlu1 %558 }
 0x233   :  { %v566_v25 = vsel %vm164_vm1, %v557_v13, %v559_v24  ;;  %v565_v18 = vsel %vm164_vm1, %v559_v24, %v561_v11 }
 0x234   :  { %v569_v19 = vmul.f32 %v566_v25, %v1032_v26  ;;  %v570_v51 = vmul.f32 %v565_v18, %v1045_v33 }
 0x236   :  { %v577_v43 = vpop.permute.xlu0 %576  ;;  %v563_v44 = vpop.permute.xlu1 %562  ;;  %v641_v50 = vpack.c.bf16 %v569_v19, %v553_v41  ;;  %v642_v27 = vpack.c.bf16 %v570_v51, %v554_v56 }
 0x237   :  { %v564_v47 = vsel %vm164_vm1, %v561_v11, %v563_v44  ;;  %v567_v26 = vsel %vm164_vm1, %v563_v44, %v557_v13 }
 0x238   :  { %v568_v16 = vmul.f32 %v567_v26, %v1041_v29  ;;  %v571_v57 = vmul.f32 %v564_v47, %v1048_v34  ;;  %681 = vmatprep.subr.bf16.mxu0 %v641_v50 }
 0x23a   :  { %v640_v58 = vpack.c.bf16 %v568_v16, %v552_v52  ;;  %v589_v60 = vpop.permute.xlu0 %588  ;;  %v575_v33 = vpop.permute.xlu1 %574  ;;  %v643_v35 = vpack.c.bf16 %v571_v57, %v555_v53 }
 0x23b   :  { %v581_v61 = vsel %vm197_vm5, %v575_v33, %v577_v43  ;;  %v582_v54 = vsel %vm197_vm5, %v573_v42, %v575_v33 }
 0x23c   :  { %v584_v59 = vmul.f32 %v582_v54, %v1136_v15  ;;  %v585_v29 = vmul.f32 %v581_v61, %v1144_v21  ;;  %682 = vmatpush1.bf16.msra.mxu0 %v640_v58  ;;  %722 = vmatprep.subr.bf16.mxu1 %v643_v35 }
 0x23d   :  { %723 = vmatpush1.bf16.msra.mxu1 %v642_v27 }
 0x23e   :  { %v644_v34 = vpack.c.bf16 %v584_v59, %v1248_v3  ;;  %v593_v55 = vpop.permute.xlu0 %592  ;;  %v579_v17 = vpop.permute.xlu1 %578  ;;  %v645_v62 = vpack.c.bf16 %v585_v29, %v1256_v4 }
 0x23f   :  { %v580_v63 = vsel %vm197_vm5, %v577_v43, %v579_v17  ;;  %v583_v1 = vsel %vm197_vm5, %v579_v17, %v573_v42 }
 0x240   :  { %v586_v10 = vmul.f32 %v580_v63, %v1147_v23  ;;  %v587_v15 = vmul.f32 %v583_v1, %v1141_v20  ;;  %683 = vmatprep.subr.bf16.mxu0 %v645_v62 }
 0x241   :  { %684 = vmatpush1.bf16.msra.mxu0 %v644_v34 }
 0x242   :  { %v646_v21 = vpack.c.bf16 %v586_v10, %v1250_v2  ;;  %v605_v13 = vpop.permute.xlu0 %604  ;;  %v591_v3 = vpop.permute.xlu1 %590  ;;  %v647_v28 = vpack.c.bf16 %v587_v15, %v1262_v0 }
 0x243   :  { %v597_v36 = vsel %vm230_vm7, %v591_v3, %v593_v55  ;;  %v598_v23 = vsel %vm230_vm7, %v589_v60, %v591_v3 }
 0x244   :  { %724 = vmatprep.subr.bf16.mxu1 %v647_v28  ;;  %v600_v37 = vmul.f32 %v598_v23, %v1177_v49  ;;  %v601_v0 = vmul.f32 %v597_v36, %v1195_v6 }
 0x245   :  { %725 = vmatpush1.bf16.msra.mxu1 %v646_v21 }
 0x246   :  { %v609_v4 = vpop.permute.xlu0 %608  ;;  %v595_v32 = vpop.permute.xlu1 %594 }
 0x247   :  { %v596_v25 = vsel %vm230_vm7, %v593_v55, %v595_v32  ;;  %v599_v41 = vsel %vm230_vm7, %v595_v32, %v589_v60 }
 0x248   :  { %v602_v6 = vmul.f32 %v596_v25, %v1198_v9 }
 0x24a   :  { %v607_v11 = vpop.permute.xlu1 %606  ;;  %v621_v38 = vpop.permute.xlu0 %620 }
 0x24b   :  { %v613_v20 = vsel %vm263_vm6, %v607_v11, %v609_v4  ;;  %v614_v2 = vsel %vm263_vm6, %v605_v13, %v607_v11 }
 0x24c   :  { %v616_v42 = vmul.f32 %v614_v2, %v1150_v31  ;;  %v617_v24 = vmul.f32 %v613_v20, %v1168_v45  ;;  %v603_v31 = vmul.f32 %v599_v41, %v1192_v5 }
 0x24e   :  { %v648_v18 = vpack.c.bf16 %v616_v42, %v600_v37  ;;  %v611_v19 = vpop.permute.xlu1 %610  ;;  %v649_v22 = vpack.c.bf16 %v617_v24, %v601_v0  ;;  %v625_v43 = vpop.permute.xlu0 %624 }
 0x24f   :  { %v612_v39 = vsel %vm263_vm6, %v609_v4, %v611_v19  ;;  %v615_v49 = vsel %vm263_vm6, %v611_v19, %v605_v13 }
 0x250   :  { %v618_v45 = vmul.f32 %v612_v39, %v1173_v48  ;;  %v619_v40 = vmul.f32 %v615_v49, %v1159_v30  ;;  %685 = vmatprep.subr.bf16.mxu0 %v649_v22 }
 0x251   :  { %686 = vmatpush1.bf16.msra.mxu0 %v648_v18 }
 0x252   :  { %v650_v44 = vpack.c.bf16 %v618_v45, %v602_v6  ;;  %v623_v50 = vpop.permute.xlu1 %622  ;;  %v651_v51 = vpack.c.bf16 %v619_v40, %v603_v31 }
 0x253   :  { %v629_v47 = vsel %vm296_vm8, %v623_v50, %v625_v43  ;;  %v630_v26 = vsel %vm296_vm8, %v621_v38, %v623_v50 }
 0x254   :  { %v632_v9 = vmul.f32 %v1211_v46, %v630_v26  ;;  %v633_v5 = vmul.f32 %v1230_v8, %v629_v47  ;;  %726 = vmatprep.subr.bf16.mxu1 %v651_v51  ;;  %v656_v8 = vld [vmem:[%s1446_s4] sm:$0xf]  ;;  %s872_s4 = smov [#allocation5]  }
 0x255   :  { %727 = vmatpush1.bf16.msra.mxu1 %v650_v44  ;;  %s775_s26 = sshll.u32 %s872_s4, 4  ;;  %s776_s26 = int_to_ptr.vmem [resolvable:$true] %s775_s26 }
 0x256   :  { %v652_v48 = vpack.c.bf16 %v632_v9, %v632_v9  ;;  %v653_v30 = vpack.c.bf16 %v633_v5, %v633_v5  ;;  %v627_v52 = vpop.permute.xlu1 %626  ;;  %s834_s27 = scalar_lea.vmem %s776_s26, 512  ;;  %p839_p9 = scmp.lt.s32.totalorder %s776_s26, %s776_s26 }
 0x257   :  { %v628_v53 = vsel %vm296_vm8, %v625_v43, %v627_v52  ;;  %v631_v16 = vsel %vm296_vm8, %v627_v52, %v621_v38  ;;  %p835_p8 = scmp.ne.s32.totalorder %s776_s26, %s834_s27  ;;  %p840_p10 = scmp.lt.s32.totalorder %s834_s27, %s834_s27 }
 0x258   :  { %v634_v57 = vmul.f32 %v1232_v12, %v628_v53  ;;  %v635_v56 = vmul.f32 %v1228_v7, %v631_v16  ;;  %792 = vmatprep.subr.msk.bf16.mxu0 %vm369_vm3, %v653_v30  ;;  %v668_v46 = vsel %vm369_vm3, %v652_v48, 0 }
 0x259   :  { %688 = vmatpush1.bf16.msra.mxu0 %v668_v46  ;;  %p841_p11 = por %p840_p10, %p839_p9 }
 0x25a   :  { %v654_v58 = vpack.c.bf16 %v634_v57, %v634_v57  ;;  %v655_v60 = vpack.c.bf16 %v635_v56, %v635_v56 }
 0x25b   :  { %p842_p12 = pnand %p841_p11, %p835_p8 }
 0x25c   :  { %793 = vmatmul.mubr.msk.bf16.vlgmr.msra.gmra.mrb[4].mxu0 %vm663_vm11, %v656_v8  ;;  %794 = vmatprep.subr.msk.bf16.mxu1 %vm369_vm3, %v655_v60  ;;  %v674_v14 = vsel %vm369_vm3, %v654_v58, 0 }
 0x25d   :  { %729 = vmatpush1.bf16.msra.mxu1 %v674_v14 }
 0x25f   :  { %v661_v7 = vpop.permute.xlu0 %660 }
 0x260   :  { %795 = vmatmul.mubr.msk.bf16.vlgmr.msra.gmra.mrb[4].mxu1 %vm663_vm11, %v656_v8 }
 0x32f   :  { %v713_v12 = vpop.f32.mrb[4].mxu0 }
 0x330   :  { %v714_v33 = vadd.f32 %v713_v12, %v661_v7  ;;  %v715_v35 = vpop.f32.mrb[5].mxu0 }
 0x331   :  { %v716_v27 = vadd.f32 %v715_v35, %v661_v7  ;;  %v717_v61 = vpop.f32.mrb[6].mxu0 }
 0x332   :  { %v761_v54 = vmax.f32 %v714_v33, 0.0  ;;  %v718_v59 = vpop.f32.mrb[7].mxu0 }
 0x333   :  { %v762_v29 = vmax.f32 %v716_v27, 0.0  ;;  %v754_v34 = vpop.f32.mrb[4].mxu1 }
 0x334   :  { %765 = vst [vmem:[#allocation5] sm:$0xff] %v761_v54  ;;  %v755_v55 = vadd.f32 %v754_v34, %v661_v7  ;;  %v756_v17 = vpop.f32.mrb[5].mxu1 }
 0x335   :  { %766 = vst [vmem:[#allocation5 + $0x8] sm:$0xff] %v762_v29  ;;  %v757_v62 = vadd.f32 %v756_v17, %v661_v7  ;;  %v758_v63 = vpop.f32.mrb[6].mxu1 }
 0x336   :  { %v763_v1 = vmax.f32 %v755_v55, 0.0  ;;  %v759_v10 = vpop.f32.mrb[7].mxu1 }
 0x337   :  { %v764_v15 = vmax.f32 %v757_v62, 0.0 }
 0x338   :  { %767 = vst [vmem:[#allocation5 + $0x10] sm:$0xff] %v763_v1 }
 0x339   :  { %768 = vst [vmem:[#allocation5 + $0x18] sm:$0xff] %v764_v15 }
 0x33a   :  { %845 = shalt.err (!%p842_p12)
}
 0x33b   :  { %s846_s30 = scalar_lea.hbm %s1448_s6, 512 }
 0x33c   :  { %p847_p13 = scmp.ne.s32.totalorder %s1448_s6, %s846_s30  ;;  %p850_p0 = scmp.lt.u32.totalorder %s846_s30, %s1448_s6 }
 0x33e   :  { %p852_p1 = pnand %p850_p0, %p847_p13 }
 0x340   :  { %855 = shalt.err (!%p852_p1)
}
 0x341   :  { %778 = dma.vmem_to_hbm [thread:$0]  %s776_s26, 512, %s1448_s6, [#allocation4]  }
 0x342   :  { %858 = dma.done.wait [#allocation4], 512  }
 0x343   :  { %859 = vsyncadd [#allocation4], 4294966784 }
 0x344   :  { %782 = vsyncpa [#allocation3], 1 }
 0x345   :  { %783 = vsyncpa [#allocation4], 1 }

</bundles_post_ra>
